<compile_context>
chip_gen: v6e
topology: v6e:2x2x1
jax: 0.10.0
libtpu: 0.0.40
codegen_flags: <defaults>
</compile_context>

<pallas_src>
import functools

import jax
import jax.numpy as jnp
from jax.experimental import pallas as pl
from jax.experimental.pallas import tpu as pltpu


def _cdiv(a, b):
    return (a + b - 1) // b


def _round_down(x, m):
    return (x // m) * m


# ----------------------------------------------------------------------------
# Pallas kernel: one row block -> one partial-sum tile
# ----------------------------------------------------------------------------
def _nce_softmax_loss_kernel(x_ref, o_ref, *, bsz, tm):
    i = pl.program_id(0)

    x = x_ref[...].astype(jnp.float32)                       # (tm, K) f32
    m = jnp.max(x, axis=-1, keepdims=True)                   # (tm, 1)
    s = jnp.sum(jnp.exp(x - m), axis=-1, keepdims=True)      # (tm, 1)
    lse = m + jnp.log(s)                                     # (tm, 1)
    loss = lse - x[:, 0:1]                                   # label == 0

    # Mask rows beyond the true batch size (partial last block reads are
    # undefined; the select discards them, including NaN/inf).
    row_ids = i * tm + jax.lax.broadcasted_iota(jnp.int32, (tm, 1), 0)
    loss = jnp.where(row_ids < bsz, loss, 0.0)

    partial = jnp.sum(loss)                                  # scalar, once per block

    # Write the partial sum at [0, 0] of this block's private output tile;
    # everything else is zero, so a plain jnp.sum outside recovers the total.
    r = jax.lax.broadcasted_iota(jnp.int32, (8, 128), 0)
    c = jax.lax.broadcasted_iota(jnp.int32, (8, 128), 1)
    o_ref[...] = jnp.where((r == 0) & (c == 0), partial, 0.0)


# ----------------------------------------------------------------------------
# Wrapper
# ----------------------------------------------------------------------------
def nce_softmax_loss(x):
    """Pallas implementation of NCESoftmaxLoss.forward(x) -> scalar loss."""
    bsz = x.shape[0]
    # torch's x.squeeze(), but never drop the batch dim (guards bsz == 1).
    squeeze_axes = tuple(a for a in range(1, x.ndim) if x.shape[a] == 1)
    x2 = jnp.squeeze(x, axis=squeeze_axes) if squeeze_axes else x
    if x2.ndim != 2:
        raise ValueError(f"expected 2-D logits after squeeze, got {x2.shape}")
    k = x2.shape[1]

    itemsize = jnp.dtype(x2.dtype).itemsize
    sub = max(8, 32 // itemsize)          # sublane pack: 8 f32, 16 bf16, 32 int8
    kp_lanes = _cdiv(k, 128) * 128        # lane-padded width inside VMEM

    # Row tile: multiple of `sub`, sized so one block is ~<= 8 MiB of VMEM.
    target_block_bytes = 8 * 1024 * 1024
    max_rows = max(sub, _round_down(target_block_bytes // (kp_lanes * itemsize), sub))
    if bsz >= sub:
        tm = min(_round_down(bsz, sub), max_rows)   # tm <= bsz, multiple of sub
    else:
        tm = bsz                                    # full-extent block (exempt)
    grid_m = _cdiv(bsz, tm)

    block_bytes = tm * kp_lanes * itemsize
    # 2x for input double-buffering + output tiles + headroom; capped well
    # under v7x's 64 MiB physical VMEM.
    vmem_limit = int(min(48 << 20, max(16 << 20, 2 * block_bytes + (4 << 20))))

    # TODO(synk): for extremely wide K (single-row blocks >> 8 MiB), tile K as
    # a second "arbitrary" grid axis with an online logsumexp.
    out = pl.pallas_call(
        functools.partial(_nce_softmax_loss_kernel, bsz=bsz, tm=tm),
        out_shape=jax.ShapeDtypeStruct((grid_m * 8, 128), jnp.float32),
        grid_spec=pltpu.PrefetchScalarGridSpec(
            num_scalar_prefetch=0,
            grid=(grid_m,),
            in_specs=[pl.BlockSpec((tm, k), lambda i: (i, 0))],
            out_specs=pl.BlockSpec((8, 128), lambda i: (i, 0)),
        ),
        compiler_params=pltpu.CompilerParams(
            dimension_semantics=("parallel",),
            vmem_limit_bytes=vmem_limit),
    )(x2)

    # Tiny finalize in XLA: sum of per-block partials, then the mean.
    return jnp.sum(out) * (1.0 / float(bsz))


# ----------------------------------------------------------------------------
# Demo / self-check
# ----------------------------------------------------------------------------
if __name__ == "__main__":
    key = jax.random.PRNGKey(0)
    bsz, n_logits = 8, 65                       # 1 positive + 64 negatives
    # Same layout the PyTorch module receives in CPC/CMC: (bsz, K, 1).
    x = 3.0 * jax.random.normal(key, (bsz, n_logits, 1), jnp.float32)

    loss_fn = jax.jit(nce_softmax_loss)
    loss = jax.block_until_ready(loss_fn(x))

    # Pure-JAX reference (CrossEntropyLoss with target 0, mean reduction).
    x2 = jnp.squeeze(x, axis=-1).astype(jnp.float32)
    ref = jnp.mean(jax.nn.logsumexp(x2, axis=1) - x2[:, 0])

    assert loss.shape == (), loss.shape
    assert bool(jnp.isfinite(loss))
    assert bool(jnp.allclose(loss, ref, rtol=1e-5, atol=1e-5)), (loss, ref)
    print("KERNEL_OK")
</pallas_src>

<mosaic_0001>
module attributes {stable_mosaic.version = 11 : i64} {
  func.func @_nce_softmax_loss_kernel(%arg0: i32, %arg1: memref<8x65xf32, #tpu.memory_space<vmem>>, %arg2: memref<8x128xf32, #tpu.memory_space<vmem>>) attributes {dimension_semantics = [#tpu.dimension_semantics<parallel>], iteration_bounds = array<i64: 1>, scalar_prefetch = 0 : i64, scratch_operands = 0 : i64, tpu.core_type = #tpu.core_type<tc>, window_params = [{transform_indices = @transform_0, window_bounds = array<i64: 8, 65>}, {transform_indices = @transform_1, window_bounds = array<i64: 8, 128>}]} {
    %c0 = arith.constant 0 : index
    %c0_0 = arith.constant 0 : index
    %0 = vector.load %arg1[%c0, %c0_0] : memref<8x65xf32, #tpu.memory_space<vmem>>, vector<8x65xf32>
    %cst = arith.constant dense<0xFF800000> : vector<8xf32>
    %1 = vector.multi_reduction <maximumf>, %0, %cst [1] : vector<8x65xf32> to vector<8xf32>
    %2 = vector.shape_cast %1 : vector<8xf32> to vector<8x1xf32>
    %3 = vector.broadcast %2 : vector<8x1xf32> to vector<8x65xf32>
    %4 = arith.subf %0, %3 : vector<8x65xf32>
    %5 = math.exp %4 : vector<8x65xf32>
    %cst_1 = arith.constant dense<0.000000e+00> : vector<8xf32>
    %6 = vector.multi_reduction <add>, %5, %cst_1 [1] : vector<8x65xf32> to vector<8xf32>
    %7 = vector.shape_cast %6 : vector<8xf32> to vector<8x1xf32>
    %8 = math.log %7 : vector<8x1xf32>
    %9 = arith.addf %2, %8 : vector<8x1xf32>
    %10 = vector.extract_strided_slice %0 {offsets = [0, 0], sizes = [8, 1], strides = [1, 1]} : vector<8x65xf32> to vector<8x1xf32>
    %11 = arith.subf %9, %10 : vector<8x1xf32>
    %c8_i32 = arith.constant 8 : i32
    %12 = arith.muli %arg0, %c8_i32 : i32
    %13 = tpu.iota {dimensions = array<i32: 0>} : vector<8x1xi32>
    %14 = vector.broadcast %12 : i32 to vector<8x1xi32>
    %15 = arith.addi %14, %13 : vector<8x1xi32>
    %c8_i32_2 = arith.constant 8 : i32
    %16 = vector.broadcast %c8_i32_2 : i32 to vector<8x1xi32>
    %17 = arith.cmpi slt, %15, %16 : vector<8x1xi32>
    %cst_3 = arith.constant 0.000000e+00 : f32
    %18 = vector.broadcast %cst_3 : f32 to vector<8x1xf32>
    %19 = arith.select %17, %11, %18 : vector<8x1xi1>, vector<8x1xf32>
    %20 = vector.shape_cast %19 : vector<8x1xf32> to vector<1x8x1xf32>
    %cst_4 = arith.constant dense<0.000000e+00> : vector<1xf32>
    %21 = vector.multi_reduction <add>, %20, %cst_4 [1, 2] : vector<1x8x1xf32> to vector<1xf32>
    %22 = vector.shape_cast %21 : vector<1xf32> to vector<1x1x1xf32>
    %23 = vector.extract %22[0, 0, 0] : f32 from vector<1x1x1xf32>
    %24 = tpu.iota {dimensions = array<i32: 0>} : vector<8x128xi32>
    %25 = tpu.iota {dimensions = array<i32: 1>} : vector<8x128xi32>
    %c0_i32 = arith.constant 0 : i32
    %26 = vector.broadcast %c0_i32 : i32 to vector<8x128xi32>
    %27 = arith.cmpi eq, %24, %26 : vector<8x128xi32>
    %c0_i32_5 = arith.constant 0 : i32
    %28 = vector.broadcast %c0_i32_5 : i32 to vector<8x128xi32>
    %29 = arith.cmpi eq, %25, %28 : vector<8x128xi32>
    %30 = arith.andi %27, %29 : vector<8x128xi1>
    %cst_6 = arith.constant 0.000000e+00 : f32
    %31 = vector.broadcast %23 : f32 to vector<8x128xf32>
    %32 = vector.broadcast %cst_6 : f32 to vector<8x128xf32>
    %33 = arith.select %30, %31, %32 : vector<8x128xi1>, vector<8x128xf32>
    %c0_7 = arith.constant 0 : index
    %c0_8 = arith.constant 0 : index
    %34 = vector.load %arg2[%c0_7, %c0_8] : memref<8x128xf32, #tpu.memory_space<vmem>>, vector<8x128xf32>
    tpu.vector_store %arg2[%c0_7, %c0_8], %33 {strides = array<i32>} : memref<8x128xf32, #tpu.memory_space<vmem>>, vector<8x128xf32>,
    return
  }
  func.func @transform_0(%arg0: i32) -> (i32, i32) {
    %c0_i32 = arith.constant 0 : i32
    %c0_i32_0 = arith.constant 0 : i32
    return %arg0, %c0_i32 : i32, i32
  }
  func.func @transform_1(%arg0: i32) -> (i32, i32) {
    %c0_i32 = arith.constant 0 : i32
    %c0_i32_0 = arith.constant 0 : i32
    return %arg0, %c0_i32 : i32, i32
  }
}

</mosaic_0001>

<bundles_post_ra>
// kernel: nce_softmax_loss.1
= control target key start
LH: loop header
LB: loop body
LE: loop exit
PB: predicated region body
PF: predicated region fallthrough
CT: control target
= control target key end

     0   :  { %6 = vsyncpa [#allocation3], 0  ;;  %s95_s6 = smov [#allocation2]   ;;  %s112_s0 = inlined_call_operand.hbm [shape: f32[8,65], index: 0, kind: input, shape index: {}]   ;;  %s113_s1 = inlined_call_operand.vmem [shape: f32[8,128], index: 1, kind: output, shape index: {}]  }
   0x1   :  { %s13_s7 = sshll.u32 %s95_s6, 4  ;;  %s14_s7 = int_to_ptr.vmem [resolvable:$true] %s13_s7 }
   0x2   :  { %s81_s8 = scalar_lea.vmem %s14_s7, 128  ;;  %p86_p1 = scmp.lt.s32.totalorder %s14_s7, %s14_s7 }
   0x3   :  { %p82_p0 = scmp.ne.s32.totalorder %s14_s7, %s81_s8  ;;  %p87_p2 = scmp.lt.s32.totalorder %s81_s8, %s81_s8 }
   0x5   :  { %p88_p3 = por %p87_p2, %p86_p1 }
   0x7   :  { %p89_p4 = pnand %p88_p3, %p82_p0 }
   0x9   :  { %92 = shalt.err (!%p89_p4)
}
   0xa   :  { %16 = dma.hbm_to_vmem [thread:$0]  %s112_s0, 128, %s14_s7, [#allocation3]  }
   0xb   :  { %93 = dma.done.wait [#allocation3], 128  }
   0xc   :  { %94 = vsyncadd [#allocation3], 4294967168  ;;  %vm21_vm0 = vcmask 531456   ;;  %v20_v0 = vld [vmem:[#allocation2] sm:$0xff]  ;;  %vm42_vm1 = vcmask 7168   ;;  %v36_v20 = vlaneseq }
   0xd   :  { %v22_v1 = vsel %vm21_vm0, %v20_v0, -inf }
   0xe   :  { %23 = vmax.xlane.f32.xlu0 %v22_v1  ;;  %v37_v21 = vshrl.u32 %v36_v20, 7  ;;  %v54_v22 = vand.u32 127, %v36_v20 }
  0x10   :  { %vm55_vm2 = vcmp.eq.s32.totalorder %v37_v21, 0  ;;  %vm56_vm3 = vcmp.eq.s32.totalorder %v54_v22, 0 }
  0x11   :  { %vm57_vm4 = vmand %vm55_vm2, %vm56_vm3 }
  0x97   :  { %v24_v2 = vpop.xlane.xlu0 %23 }
  0x98   :  { %v25_v3 = vsub.f32 %v20_v0, %v24_v2 }
  0x9a   :  { %v26_v4 = vmul.f32 1.442695, %v25_v3 }
  0x9c   :  { %69 = vpow2.f32 %v26_v4 }
  0xa9   :  { %v70_v5 = vpop.eup %69 }
  0xaa   :  { %v28_v6 = vsel %vm21_vm0, %v70_v5, 0.0 }
  0xab   :  { %29 = vadd.xlane.f32.xlu0 %v28_v6 }
 0x134   :  { %v30_v7 = vpop.xlane.xlu0 %29 }
 0x135   :  { %71 = vlog2.f32 %v30_v7 }
 0x142   :  { %v72_v8 = vpop.eup %71 }
 0x143   :  { %v32_v9 = vmul.f32 0.6931472, %v72_v8 }
 0x145   :  { %v33_v10 = vadd.f32 %v32_v9, %v24_v2 }
 0x147   :  { %v34_v11 = vsub.f32 %v33_v10, %v20_v0 }
 0x149   :  { %v43_v12 = vsel %vm42_vm1, %v34_v11, 0.0 }
 0x14a   :  { %44 = vadd.xlane.f32.xlu1 %v43_v12 }
 0x1d3   :  { %v45_v13 = vpop.xlane.xlu1 %44 }
 0x1d4   :  { %v46_v14 = vrot.slane %v45_v13, 4 }
 0x1d6   :  { %v47_v15 = vadd.f32 %v46_v14, %v45_v13 }
 0x1d8   :  { %v48_v16 = vrot.slane %v47_v15, 2 }
 0x1da   :  { %v49_v17 = vadd.f32 %v48_v16, %v47_v15 }
 0x1dc   :  { %v50_v18 = vrot.slane %v49_v17, 1 }
 0x1de   :  { %v51_v19 = vadd.f32 %v50_v18, %v49_v17 }
 0x1e0   :  { %66 = vpush %v51_v19 }
 0x211   :  { %s67_s0 = spop %66 }
 0x212   :  { %v58_v23 = vstv %s67_s0 }
 0x213   :  { %v59_v24 = vsel %vm57_vm4, %v58_v23, 0.0 }
 0x214   :  { %60 = vst [vmem:[%s113_s1] sm:$0xff] %v59_v24 }
 0x215   :  { %65 = vsyncpa [#allocation3], 1 }

</bundles_post_ra>
